<compile_context>
chip_gen: v7x
topology: tpu7x:2x2x1
jax: 0.10.0
libtpu: 0.0.40
codegen_flags: <defaults>
</compile_context>

<pallas_src>
import numpy as np
import jax
import jax.numpy as jnp
from jax.experimental import pallas as pl
from jax.experimental.pallas import tpu as pltpu

QUANTILE = 6
QCOEFS = (-3.0, -0.834, -0.248, 0.248, 0.834)


def _make_kernel(H, M, M_pad, OUT, small_pad, bias_val):
    Q = QUANTILE

    def ehh_kernel(x_ref, iscale_ref, ishift_ref, ew_ref, eb_ref,
                   bnscale_ref, bnshift_ref, qshift_ref, sel_ref,
                   wmax_ref, wmin_ref, maxcat_ref, small_ref):
        x = x_ref[...]                                        # (TB, IN) f32
        TB = x.shape[0]

        # --- normalization_layer (batch min/max hoisted to the XLA pre-pass) ---
        normed = x * iscale_ref[...] + ishift_ref[...]

        # --- Encoder linear: bf16 MXU operands, f32 accumulation ---
        emb = jnp.dot(normed.astype(jnp.bfloat16), ew_ref[...],
                      preferred_element_type=jnp.float32) + eb_ref[...]

        # --- Batch_Norm_Layer (batch mean/var hoisted): single f32 FMA ---
        bn = emb * bnscale_ref[...] + bnshift_ref[...]        # (TB, H) f32

        # --- Maxout_Layer: 6 maps = relu(bn - shift_q), q-major, bf16 chain ---
        bn_bf = bn.astype(jnp.bfloat16)
        tiled = jnp.concatenate([bn_bf] * Q, axis=1)          # (TB, Q*H) bf16
        max_cat = jnp.maximum(tiled - qshift_ref[...], 0)     # (TB, Q*H) bf16

        # --- Minout_Layer: lane-aligned selector gather in one bf16 MXU dot ---
        res = jnp.dot(max_cat, sel_ref[...],
                      preferred_element_type=jnp.float32)     # (TB, 2*M_pad) f32
        min_x = jnp.minimum(res[:, :M], res[:, M_pad:M_pad + M])

        # --- output projection in f32 (tight `out` precision, review item 10) ---
        out = (jnp.dot(max_cat.astype(jnp.float32), wmax_ref[...],
                       preferred_element_type=jnp.float32)
               + jnp.dot(min_x, wmin_ref[...],
                         preferred_element_type=jnp.float32)
               + bias_val)

        # --- split, lane-dense outputs ---
        maxcat_ref[...] = max_cat
        pieces = [emb, min_x, out]
        if small_pad > 0:
            pieces.append(jnp.zeros((TB, small_pad), jnp.float32))
        small_ref[...] = jnp.concatenate(pieces, axis=1)

    return ehh_kernel


def build_ehh_forward(params, chosen_index, *, tile_b=512):
    """Builds a jitted forward pass.  Adjacency / permutation / weight-layout
    constants are constructed exactly once here (not per call)."""
    H = params["gamma"].shape[-1]
    IN = params["enc_wT"].shape[0]
    Q = QUANTILE
    QH = Q * H
    M = int(chosen_index.shape[0])
    OUT = params["w"].shape[-1]
    M_pad = 128 * ((M + 127) // 128)          # lane-aligned selector column blocks

    # chosen_index rows are (count, n1, q1, n2, q2), as in the CSV test-mode path.
    ci = np.asarray(chosen_index)
    n1, q1 = ci[:, 1].astype(np.int64), ci[:, 2].astype(np.int64)
    n2, q2 = ci[:, 3].astype(np.int64), ci[:, 4].astype(np.int64)
    sel = np.zeros((QH, 2 * M_pad), np.float32)
    sel[q1 * H + n1, np.arange(M)] = 1.0
    sel[q2 * H + n2, M_pad + np.arange(M)] = 1.0
    sel = jnp.asarray(sel, jnp.bfloat16)            # 0/1 entries: exact in bf16

    # Reorder the "max" rows of w from the PyTorch flatten order (h*Q + q) to the
    # kernel's q-major order (q*H + h).  The "min" rows stay as-is.  f32.
    perm = np.array([h * Q + q for q in range(Q) for h in range(H)])
    w_np = np.asarray(params["w"], np.float32)
    w_max_q = jnp.asarray(w_np[:QH][perm], jnp.float32)
    w_min = jnp.asarray(w_np[QH:], jnp.float32)

    enc_wT_f32 = jnp.asarray(params["enc_wT"], jnp.float32)
    enc_wT_bf = enc_wT_f32.astype(jnp.bfloat16)
    enc_b = jnp.asarray(params["enc_b"], jnp.float32).reshape(1, H)
    gamma = jnp.asarray(params["gamma"], jnp.float32).reshape(1, H)
    beta = jnp.asarray(params["beta"], jnp.float32).reshape(1, H)
    bias_val = float(np.asarray(params["bias"]).reshape(-1)[0])  # baked scalar

    SMALL = 128 * ((H + M + OUT + 127) // 128)      # lane-dense small slab width
    small_pad = SMALL - (H + M + OUT)
    kernel = _make_kernel(H, M, M_pad, OUT, small_pad, bias_val)

    @jax.jit
    def forward(x):
        x = x.astype(jnp.float32)
        B = x.shape[0]

        # ---- stats pre-pass: full-batch statistics as cheap XLA reductions ----
        dmin = jnp.min(x, axis=0, keepdims=True)
        dmax = jnp.max(x, axis=0, keepdims=True)
        inv_rng = 1.0 / (dmax - dmin + 1e-5)            # exact divide
        in_scale = inv_rng
        in_shift = -dmin * inv_rng
        normed = x * in_scale + in_shift
        emb_s = normed @ enc_wT_f32 + enc_b             # f32, stats only
        mean = jnp.mean(emb_s, axis=0, keepdims=True)
        var = jnp.mean(jnp.square(emb_s - mean), axis=0, keepdims=True)  # centered
        bn_scale = gamma / jnp.sqrt(var + 1e-3)
        bn_shift = beta - mean * bn_scale
        # per-map subtractive shifts, q-major; map 0 (plain relu) has none
        qshift = jnp.concatenate(
            [jnp.zeros_like(mean)]
            + [(c * var + mean) * gamma - beta for c in QCOEFS],
            axis=1).astype(jnp.bfloat16)                # (1, Q*H)

        # ---- batch tiling: balanced, sublane-aligned tiles ----
        n_tiles = max(1, (B + tile_b - 1) // tile_b)
        tb = (B + n_tiles - 1) // n_tiles
        tb = 8 * ((tb + 7) // 8)
        B_pad = tb * n_tiles
        x_in = jnp.pad(x, ((0, B_pad - B), (0, 0))) if B_pad != B else x

        bcast = lambda shape: pl.BlockSpec(shape, lambda i: (0, 0))
        cost = pl.CostEstimate(
            flops=2 * B_pad * (IN * H + QH * 2 * M_pad + QH * OUT + M * OUT),
            transcendentals=0,
            bytes_accessed=(B_pad * IN * 4 + IN * H * 2 + QH * 2 * M_pad * 2
                            + (QH + M) * OUT * 4
                            + B_pad * QH * 2 + B_pad * SMALL * 4))

        maxcat, small = pl.pallas_call(
            kernel,
            grid=(n_tiles,),
            out_shape=(jax.ShapeDtypeStruct((B_pad, QH), jnp.bfloat16),
                       jax.ShapeDtypeStruct((B_pad, SMALL), jnp.float32)),
            in_specs=[
                pl.BlockSpec((tb, IN), lambda i: (i, 0)),      # x (batch-tiled)
                bcast((1, IN)), bcast((1, IN)),                # in_scale, in_shift
                bcast((IN, H)), bcast((1, H)),                 # enc_w (bf16), enc_b
                bcast((1, H)), bcast((1, H)),                  # bn_scale, bn_shift
                bcast((1, QH)),                                # qshift (bf16)
                bcast((QH, 2 * M_pad)),                        # sel (bf16)
                bcast((QH, OUT)), bcast((M, OUT)),             # w_max_q, w_min (f32)
            ],
            out_specs=(pl.BlockSpec((tb, QH), lambda i: (i, 0)),
                       pl.BlockSpec((tb, SMALL), lambda i: (i, 0))),
            compiler_params=pltpu.CompilerParams(
                dimension_semantics=("parallel",),
                vmem_limit_bytes=32 * 1024 * 1024),
            cost_estimate=cost,
        )(x_in, in_scale, in_shift, enc_wT_bf, enc_b, bn_scale, bn_shift,
          qshift, sel, w_max_q, w_min)

        emb = small[:B, :H]
        min_x = small[:B, H:H + M]
        out = small[:B, H + M:H + M + OUT]
        # reconstruct the PyTorch-layout max_x: (B, H, Q)
        max_x = maxcat[:B].astype(jnp.float32).reshape(B, Q, H).transpose(0, 2, 1)
        return emb, out, max_x, min_x

    return forward


if __name__ == "__main__":
    B, IN, HID, OUT_SIZE, M = 8, 16, 32, 4, 20

    key = jax.random.PRNGKey(0)
    k_x, k_ew, k_eb, k_w, k_b = jax.random.split(key, 5)

    x = jax.random.normal(k_x, (B, IN), jnp.float32)
    params = dict(
        enc_wT=jax.random.normal(k_ew, (IN, HID), jnp.float32) * 0.1,  # Linear weight.T
        enc_b=jax.random.normal(k_eb, (1, HID), jnp.float32) * 0.1,
        gamma=jnp.ones((1, HID), jnp.float32),
        beta=jnp.zeros((1, HID), jnp.float32),
        w=jax.random.normal(k_w, (HID * QUANTILE + M, OUT_SIZE), jnp.float32),
        bias=jax.random.normal(k_b, (1, 1), jnp.float32),
    )

    # deterministic fixed adjacency (stand-in for models/adj30.csv test mode)
    rng = np.random.default_rng(0)
    n1 = rng.integers(0, HID, size=M)
    n2 = (n1 + 1 + rng.integers(0, HID - 1, size=M)) % HID
    q1 = rng.integers(0, QUANTILE, size=M)
    q2 = rng.integers(0, QUANTILE, size=M)
    chosen_index = np.stack([np.arange(M), n1, q1, n2, q2], axis=1).astype(np.int32)

    forward = build_ehh_forward(params, chosen_index)
    emb, out, max_x, min_x = forward(x)
    jax.tree_util.tree_map(jax.block_until_ready, (emb, out, max_x, min_x))

    # pure-JAX reference (mirrors the PyTorch forward) for a sanity check
    def reference(x):
        dmin = x.min(0)
        dmax = x.max(0)
        normed = (x - dmin) / (dmax - dmin + 1e-5)
        e = normed @ params["enc_wT"] + params["enc_b"]
        mean = e.mean(0)
        var = ((e - mean) ** 2).mean(0)
        g = params["gamma"][0]
        bta = params["beta"][0]
        bn = g * (e - mean) / jnp.sqrt(var + 0.001) + bta
        outs = [jnp.maximum(bn, 0.0)]
        for c in QCOEFS:
            outs.append(jnp.maximum(bn - (c * var + mean) * g + bta, 0.0))
        mx = jnp.stack(outs, 0).transpose(1, 2, 0)        # (B, H, Q)
        d1 = mx[:, n1, q1]
        d2 = mx[:, n2, q2]
        mn = jnp.minimum(d1, d2)
        flat = mx.reshape(B, HID * QUANTILE)
        o = jnp.concatenate([flat, mn], 1) @ params["w"] + params["bias"][0, 0]
        return e, o, mx, mn

    e_r, o_r, mx_r, mn_r = reference(x)
    np.testing.assert_allclose(np.asarray(emb), np.asarray(e_r), rtol=5e-2, atol=5e-2)
    np.testing.assert_allclose(np.asarray(max_x), np.asarray(mx_r), rtol=5e-2, atol=5e-2)
    np.testing.assert_allclose(np.asarray(min_x), np.asarray(mn_r), rtol=5e-2, atol=5e-2)
    # `out` accumulates ~200 O(1) products whose LHS values carry bf16 maxout
    # rounding (weights / accumulation stay f32): the meaningful bound is rtol on
    # the O(10) outputs; atol covers entries that land near zero.  Tighter than
    # v2's 4e-1 thanks to the f32 projection weights.
    np.testing.assert_allclose(np.asarray(out), np.asarray(o_r), rtol=5e-2, atol=3e-1)

    print("KERNEL_OK")
</pallas_src>

<mosaic_0001>
module attributes {stable_mosaic.version = 11 : i64} {
  func.func @ehh_kernel(%arg0: i32, %arg1: memref<8x16xf32, #tpu.memory_space<vmem>>, %arg2: memref<1x16xf32, #tpu.memory_space<vmem>>, %arg3: memref<1x16xf32, #tpu.memory_space<vmem>>, %arg4: memref<16x32xbf16, #tpu.memory_space<vmem>>, %arg5: memref<1x32xf32, #tpu.memory_space<vmem>>, %arg6: memref<1x32xf32, #tpu.memory_space<vmem>>, %arg7: memref<1x32xf32, #tpu.memory_space<vmem>>, %arg8: memref<1x192xbf16, #tpu.memory_space<vmem>>, %arg9: memref<192x256xbf16, #tpu.memory_space<vmem>>, %arg10: memref<192x4xf32, #tpu.memory_space<vmem>>, %arg11: memref<20x4xf32, #tpu.memory_space<vmem>>, %arg12: memref<8x192xbf16, #tpu.memory_space<vmem>>, %arg13: memref<8x128xf32, #tpu.memory_space<vmem>>) attributes {dimension_semantics = [#tpu.dimension_semantics<parallel>], iteration_bounds = array<i64: 1>, scalar_prefetch = 0 : i64, scratch_operands = 0 : i64, tpu.core_type = #tpu.core_type<tc>, window_params = [{transform_indices = @transform_0, window_bounds = array<i64: 8, 16>}, {pipeline_mode = #tpu.pipeline_mode<synchronous>, transform_indices = @transform_1, window_bounds = array<i64: 1, 16>}, {pipeline_mode = #tpu.pipeline_mode<synchronous>, transform_indices = @transform_2, window_bounds = array<i64: 1, 16>}, {pipeline_mode = #tpu.pipeline_mode<synchronous>, transform_indices = @transform_3, window_bounds = array<i64: 16, 32>}, {pipeline_mode = #tpu.pipeline_mode<synchronous>, transform_indices = @transform_4, window_bounds = array<i64: 1, 32>}, {pipeline_mode = #tpu.pipeline_mode<synchronous>, transform_indices = @transform_5, window_bounds = array<i64: 1, 32>}, {pipeline_mode = #tpu.pipeline_mode<synchronous>, transform_indices = @transform_6, window_bounds = array<i64: 1, 32>}, {pipeline_mode = #tpu.pipeline_mode<synchronous>, transform_indices = @transform_7, window_bounds = array<i64: 1, 192>}, {pipeline_mode = #tpu.pipeline_mode<synchronous>, transform_indices = @transform_8, window_bounds = array<i64: 192, 256>}, {pipeline_mode = #tpu.pipeline_mode<synchronous>, transform_indices = @transform_9, window_bounds = array<i64: 192, 4>}, {pipeline_mode = #tpu.pipeline_mode<synchronous>, transform_indices = @transform_10, window_bounds = array<i64: 20, 4>}, {transform_indices = @transform_11, window_bounds = array<i64: 8, 192>}, {transform_indices = @transform_12, window_bounds = array<i64: 8, 128>}]} {
    %c0 = arith.constant 0 : index
    %c0_0 = arith.constant 0 : index
    %0 = vector.load %arg1[%c0, %c0_0] : memref<8x16xf32, #tpu.memory_space<vmem>>, vector<8x16xf32>
    %c0_1 = arith.constant 0 : index
    %c0_2 = arith.constant 0 : index
    %1 = vector.load %arg2[%c0_1, %c0_2] : memref<1x16xf32, #tpu.memory_space<vmem>>, vector<1x16xf32>
    %2 = vector.broadcast %1 : vector<1x16xf32> to vector<8x16xf32>
    %3 = arith.mulf %0, %2 : vector<8x16xf32>
    %c0_3 = arith.constant 0 : index
    %c0_4 = arith.constant 0 : index
    %4 = vector.load %arg3[%c0_3, %c0_4] : memref<1x16xf32, #tpu.memory_space<vmem>>, vector<1x16xf32>
    %5 = vector.broadcast %4 : vector<1x16xf32> to vector<8x16xf32>
    %6 = arith.addf %3, %5 : vector<8x16xf32>
    %7 = arith.truncf %6 : vector<8x16xf32> to vector<8x16xbf16>
    %c0_5 = arith.constant 0 : index
    %c0_6 = arith.constant 0 : index
    %8 = vector.load %arg4[%c0_5, %c0_6] : memref<16x32xbf16, #tpu.memory_space<vmem>>, vector<16x32xbf16>
    %cst = arith.constant dense<0.000000e+00> : vector<8x32xf32>
    %9 = tpu.matmul %7, %8, %cst {dimension_numbers = #tpu.dot_dimension_numbers<[1], [0], [0], [1], [0, 0, 1, 1], [], []>} : vector<8x16xbf16>, vector<16x32xbf16>, vector<8x32xf32> -> vector<8x32xf32>
    %c0_7 = arith.constant 0 : index
    %c0_8 = arith.constant 0 : index
    %10 = vector.load %arg5[%c0_7, %c0_8] : memref<1x32xf32, #tpu.memory_space<vmem>>, vector<1x32xf32>
    %11 = vector.broadcast %10 : vector<1x32xf32> to vector<8x32xf32>
    %12 = arith.addf %9, %11 : vector<8x32xf32>
    %c0_9 = arith.constant 0 : index
    %c0_10 = arith.constant 0 : index
    %13 = vector.load %arg6[%c0_9, %c0_10] : memref<1x32xf32, #tpu.memory_space<vmem>>, vector<1x32xf32>
    %14 = vector.broadcast %13 : vector<1x32xf32> to vector<8x32xf32>
    %15 = arith.mulf %12, %14 : vector<8x32xf32>
    %c0_11 = arith.constant 0 : index
    %c0_12 = arith.constant 0 : index
    %16 = vector.load %arg7[%c0_11, %c0_12] : memref<1x32xf32, #tpu.memory_space<vmem>>, vector<1x32xf32>
    %17 = vector.broadcast %16 : vector<1x32xf32> to vector<8x32xf32>
    %18 = arith.addf %15, %17 : vector<8x32xf32>
    %19 = arith.truncf %18 : vector<8x32xf32> to vector<8x32xbf16>
    %20 = tpu.concatenate %19, %19, %19, %19, %19, %19 in 1 : vector<8x32xbf16>, vector<8x32xbf16>, vector<8x32xbf16>, vector<8x32xbf16>, vector<8x32xbf16>, vector<8x32xbf16> -> vector<8x192xbf16>
    %c0_13 = arith.constant 0 : index
    %c0_14 = arith.constant 0 : index
    %21 = vector.load %arg8[%c0_13, %c0_14] : memref<1x192xbf16, #tpu.memory_space<vmem>>, vector<1x192xbf16>
    %22 = vector.broadcast %21 : vector<1x192xbf16> to vector<8x192xbf16>
    %23 = arith.subf %20, %22 : vector<8x192xbf16>
    %cst_15 = arith.constant 0.000000e+00 : bf16
    %24 = vector.broadcast %cst_15 : bf16 to vector<8x192xbf16>
    %25 = arith.maximumf %23, %24 : vector<8x192xbf16>
    %c0_16 = arith.constant 0 : index
    %c0_17 = arith.constant 0 : index
    %26 = vector.load %arg9[%c0_16, %c0_17] : memref<192x256xbf16, #tpu.memory_space<vmem>>, vector<192x256xbf16>
    %cst_18 = arith.constant dense<0.000000e+00> : vector<8x256xf32>
    %27 = tpu.matmul %25, %26, %cst_18 {dimension_numbers = #tpu.dot_dimension_numbers<[1], [0], [0], [1], [0, 0, 1, 1], [], []>} : vector<8x192xbf16>, vector<192x256xbf16>, vector<8x256xf32> -> vector<8x256xf32>
    %28 = vector.extract_strided_slice %27 {offsets = [0, 0], sizes = [8, 20], strides = [1, 1]} : vector<8x256xf32> to vector<8x20xf32>
    %29 = vector.extract_strided_slice %27 {offsets = [0, 128], sizes = [8, 20], strides = [1, 1]} : vector<8x256xf32> to vector<8x20xf32>
    %30 = arith.minimumf %28, %29 : vector<8x20xf32>
    %31 = arith.extf %25 : vector<8x192xbf16> to vector<8x192xf32>
    %c0_19 = arith.constant 0 : index
    %c0_20 = arith.constant 0 : index
    %32 = vector.load %arg10[%c0_19, %c0_20] : memref<192x4xf32, #tpu.memory_space<vmem>>, vector<192x4xf32>
    %cst_21 = arith.constant dense<0.000000e+00> : vector<8x4xf32>
    %33 = tpu.matmul %31, %32, %cst_21 {dimension_numbers = #tpu.dot_dimension_numbers<[1], [0], [0], [1], [0, 0, 1, 1], [], []>} : vector<8x192xf32>, vector<192x4xf32>, vector<8x4xf32> -> vector<8x4xf32>
    %c0_22 = arith.constant 0 : index
    %c0_23 = arith.constant 0 : index
    %34 = vector.load %arg11[%c0_22, %c0_23] : memref<20x4xf32, #tpu.memory_space<vmem>>, vector<20x4xf32>
    %cst_24 = arith.constant dense<0.000000e+00> : vector<8x4xf32>
    %35 = tpu.matmul %30, %34, %cst_24 {dimension_numbers = #tpu.dot_dimension_numbers<[1], [0], [0], [1], [0, 0, 1, 1], [], []>} : vector<8x20xf32>, vector<20x4xf32>, vector<8x4xf32> -> vector<8x4xf32>
    %36 = arith.addf %33, %35 : vector<8x4xf32>
    %cst_25 = arith.constant -1.02088535 : f32
    %37 = vector.broadcast %cst_25 : f32 to vector<8x4xf32>
    %38 = arith.addf %36, %37 : vector<8x4xf32>
    %c0_26 = arith.constant 0 : index
    %c0_27 = arith.constant 0 : index
    %39 = vector.load %arg12[%c0_26, %c0_27] : memref<8x192xbf16, #tpu.memory_space<vmem>>, vector<8x192xbf16>
    tpu.vector_store %arg12[%c0_26, %c0_27], %25 {strides = array<i32>} : memref<8x192xbf16, #tpu.memory_space<vmem>>, vector<8x192xbf16>,
    %cst_28 = arith.constant 0.000000e+00 : f32
    %40 = vector.broadcast %cst_28 : f32 to vector<8x72xf32>
    %41 = tpu.concatenate %12, %30, %38, %40 in 1 : vector<8x32xf32>, vector<8x20xf32>, vector<8x4xf32>, vector<8x72xf32> -> vector<8x128xf32>
    %c0_29 = arith.constant 0 : index
    %c0_30 = arith.constant 0 : index
    %42 = vector.load %arg13[%c0_29, %c0_30] : memref<8x128xf32, #tpu.memory_space<vmem>>, vector<8x128xf32>
    tpu.vector_store %arg13[%c0_29, %c0_30], %41 {strides = array<i32>} : memref<8x128xf32, #tpu.memory_space<vmem>>, vector<8x128xf32>,
    return
  }
  func.func @transform_0(%arg0: i32) -> (i32, i32) {
    %c0_i32 = arith.constant 0 : i32
    %c0_i32_0 = arith.constant 0 : i32
    return %arg0, %c0_i32 : i32, i32
  }
  func.func @transform_1(%arg0: i32) -> (i32, i32) {
    %c0_i32 = arith.constant 0 : i32
    %c0_i32_0 = arith.constant 0 : i32
    %c0_i32_1 = arith.constant 0 : i32
    return %c0_i32, %c0_i32_0 : i32, i32
  }
  func.func @transform_2(%arg0: i32) -> (i32, i32) {
    %c0_i32 = arith.constant 0 : i32
    %c0_i32_0 = arith.constant 0 : i32
    %c0_i32_1 = arith.constant 0 : i32
    return %c0_i32, %c0_i32_0 : i32, i32
  }
  func.func @transform_3(%arg0: i32) -> (i32, i32) {
    %c0_i32 = arith.constant 0 : i32
    %c0_i32_0 = arith.constant 0 : i32
    %c0_i32_1 = arith.constant 0 : i32
    return %c0_i32, %c0_i32_0 : i32, i32
  }
  func.func @transform_4(%arg0: i32) -> (i32, i32) {
    %c0_i32 = arith.constant 0 : i32
    %c0_i32_0 = arith.constant 0 : i32
    %c0_i32_1 = arith.constant 0 : i32
    return %c0_i32, %c0_i32_0 : i32, i32
  }
  func.func @transform_5(%arg0: i32) -> (i32, i32) {
    %c0_i32 = arith.constant 0 : i32
    %c0_i32_0 = arith.constant 0 : i32
    %c0_i32_1 = arith.constant 0 : i32
    return %c0_i32, %c0_i32_0 : i32, i32
  }
  func.func @transform_6(%arg0: i32) -> (i32, i32) {
    %c0_i32 = arith.constant 0 : i32
    %c0_i32_0 = arith.constant 0 : i32
    %c0_i32_1 = arith.constant 0 : i32
    return %c0_i32, %c0_i32_0 : i32, i32
  }
  func.func @transform_7(%arg0: i32) -> (i32, i32) {
    %c0_i32 = arith.constant 0 : i32
    %c0_i32_0 = arith.constant 0 : i32
    %c0_i32_1 = arith.constant 0 : i32
    return %c0_i32, %c0_i32_0 : i32, i32
  }
  func.func @transform_8(%arg0: i32) -> (i32, i32) {
    %c0_i32 = arith.constant 0 : i32
    %c0_i32_0 = arith.constant 0 : i32
    %c0_i32_1 = arith.constant 0 : i32
    return %c0_i32, %c0_i32_0 : i32, i32
  }
  func.func @transform_9(%arg0: i32) -> (i32, i32) {
    %c0_i32 = arith.constant 0 : i32
    %c0_i32_0 = arith.constant 0 : i32
    %c0_i32_1 = arith.constant 0 : i32
    return %c0_i32, %c0_i32_0 : i32, i32
  }
  func.func @transform_10(%arg0: i32) -> (i32, i32) {
    %c0_i32 = arith.constant 0 : i32
    %c0_i32_0 = arith.constant 0 : i32
    %c0_i32_1 = arith.constant 0 : i32
    return %c0_i32, %c0_i32_0 : i32, i32
  }
  func.func @transform_11(%arg0: i32) -> (i32, i32) {
    %c0_i32 = arith.constant 0 : i32
    %c0_i32_0 = arith.constant 0 : i32
    return %arg0, %c0_i32 : i32, i32
  }
  func.func @transform_12(%arg0: i32) -> (i32, i32) {
    %c0_i32 = arith.constant 0 : i32
    %c0_i32_0 = arith.constant 0 : i32
    return %arg0, %c0_i32 : i32, i32
  }
}

</mosaic_0001>

<bundles_post_ra>
// kernel: forward.1
= control target key start
LH: loop header
LB: loop body
LE: loop exit
PB: predicated region body
PF: predicated region fallthrough
CT: control target
= control target key end

     0   :  { %v739_v0 = vmov 0.0   ;;  %vm740_vm0 = vmmov 0   ;;  %vm74_vm1 = vcmask 130048   ;;  %v741_v43 = vmov 0.0|0.0   ;;  %s743_s18 = smov 32   ;;  %s744_s19 = smov 64   ;;  %s1029_s3 = inlined_call_operand.vmem [shape: bf16[16,32], index: 3, kind: input, shape index: {}]   ;;  %s1030_s0 = inlined_call_operand.vmem [shape: f32[8,16], index: 0, kind: input, shape index: {}]   ;;  %s1031_s1 = inlined_call_operand.vmem [shape: f32[1,16], index: 1, kind: input, shape index: {}]   ;;  %s1032_s2 = inlined_call_operand.vmem [shape: f32[1,16], index: 2, kind: input, shape index: {}]   ;;  %s1033_s8 = inlined_call_operand.vmem [shape: bf16[192,256], index: 8, kind: input, shape index: {}]   ;;  %s1034_s4 = inlined_call_operand.vmem [shape: f32[1,32], index: 4, kind: input, shape index: {}]   ;;  %s1035_s5 = inlined_call_operand.vmem [shape: f32[1,32], index: 5, kind: input, shape index: {}]   ;;  %s1036_s6 = inlined_call_operand.vmem [shape: f32[1,32], index: 6, kind: input, shape index: {}]   ;;  %s1037_s10 = inlined_call_operand.vmem [shape: f32[20,4], index: 10, kind: input, shape index: {}]   ;;  %s1038_s7 = inlined_call_operand.vmem [shape: bf16[1,192], index: 7, kind: input, shape index: {}]   ;;  %s1039_s11 = inlined_call_operand.vmem [shape: bf16[8,192], index: 11, kind: output, shape index: {0}]   ;;  %s1040_s9 = inlined_call_operand.vmem [shape: f32[192,4], index: 9, kind: input, shape index: {}]   ;;  %s1041_s12 = inlined_call_operand.vmem [shape: f32[8,128], index: 12, kind: output, shape index: {1}]  }
   0x1   :  { %639 = vmatprep.subr.bf16.mxu1 %v739_v0  ;;  %v702_v1 = vld [vmem:[%s1029_s3] sm:$0xff]   ;;  %641 = vmatprep.mubr.msk.bf16.mxu1 %vm740_vm0, %v739_v0  ;;  %v708_v10 = vld [vmem:[%s1033_s8 + $0x14] ss:$8 sps:$4 sm:$0xff]   ;;  %v706_v11 = vld [vmem:[%s1033_s8 + $0x10] ss:$8 sps:$4 sm:$0xff]   ;;  %v167_v49 = vlaneseq  ;;  %vm142_vm2 = vcmask 261120  }
   0x2   :  { %v41_v2 = vld [vmem:[%s1030_s0] sm:$0xff]  ;;  %651 = vmatprep.mubr.msk.f32.mxu0 %vm740_vm0, %v739_v0  ;;  %640 = vmatpush3.bf16.msra.mxu1 %v702_v1  ;;  %v714_v14 = vld [vmem:[%s1033_s8 + $0x34] ss:$8 sps:$4 sm:$0xff]   ;;  %v712_v15 = vld [vmem:[%s1033_s8 + $0x30] ss:$8 sps:$4 sm:$0xff]   ;;  %vm146_vm3 = vcmask 523264  }
   0x3   :  { %v596_v3 = vld [vmem:[%s1031_s1] ss:$0 sm:$0xff]  ;;  %v705_v9 = vld [vmem:[%s1033_s8 + $0x4] ss:$8 sps:$4 sm:$0xff]   ;;  %v720_v18 = vld [vmem:[%s1033_s8 + $0x54] ss:$8 sps:$4 sm:$0xff]   ;;  %654 = vmatprep.subr.bf16.mxu0 %v741_v43 }
   0x4   :  { %v597_v4 = vld [vmem:[%s1032_s2] ss:$0 sm:$0xff]  ;;  %v49_v5 = vmul.f32 %v596_v3, %v41_v2  ;;  %343 = vmatprep.subr.bf16.mxu1 %v705_v9  ;;  %v711_v12 = vld [vmem:[%s1033_s8 + $0x24] ss:$8 sps:$4 sm:$0xff]   ;;  %v718_v19 = vld [vmem:[%s1033_s8 + $0x50] ss:$8 sps:$4 sm:$0xff]  }
   0x5   :  { %v703_v8 = vld [vmem:[%s1033_s8] ss:$8 sps:$4 sm:$0xff]   ;;  %v717_v16 = vld [vmem:[%s1033_s8 + $0x44] ss:$8 sps:$4 sm:$0xff]   ;;  %v726_v22 = vld [vmem:[%s1033_s8 + $0x74] ss:$8 sps:$4 sm:$0xff]  }
   0x6   :  { %v57_v6 = vadd.f32 %v597_v4, %v49_v5  ;;  %v709_v13 = vld [vmem:[%s1033_s8 + $0x20] ss:$8 sps:$4 sm:$0xff]   ;;  %v723_v20 = vld [vmem:[%s1033_s8 + $0x64] ss:$8 sps:$4 sm:$0xff]   ;;  %v724_v23 = vld [vmem:[%s1033_s8 + $0x70] ss:$8 sps:$4 sm:$0xff]  }
   0x7   :  { %v715_v17 = vld [vmem:[%s1033_s8 + $0x40] ss:$8 sps:$4 sm:$0xff]   ;;  %v729_v24 = vld [vmem:[%s1033_s8 + $0x84] ss:$8 sps:$4 sm:$0xff]   ;;  %v732_v26 = vld [vmem:[%s1033_s8 + $0x94] ss:$8 sps:$4 sm:$0xff]  }
   0x8   :  { %v58_v7 = vpack.c.bf16 %v57_v6, %v57_v6  ;;  %v721_v21 = vld [vmem:[%s1033_s8 + $0x60] ss:$8 sps:$4 sm:$0xff]   ;;  %v730_v27 = vld [vmem:[%s1033_s8 + $0x90] ss:$8 sps:$4 sm:$0xff]   ;;  %v735_v28 = vld [vmem:[%s1033_s8 + $0xa4] ss:$8 sps:$4 sm:$0xff]  }
   0x9   :  { %v727_v25 = vld [vmem:[%s1033_s8 + $0x80] ss:$8 sps:$4 sm:$0xff]   ;;  %v738_v33 = vld [vmem:[%s1033_s8 + $0xb4] ss:$8 sps:$4 sm:$0xff]   ;;  %v736_v36 = vld [vmem:[%s1033_s8 + $0xb0] ss:$8 sps:$4 sm:$0xff]  }
   0xa   :  { %642 = vmatmul.mubr.msk.bf16.vlgmr.msra.gmra.mrb[0].mxu1 %vm74_vm1, %v58_v7  ;;  %v733_v29 = vld [vmem:[%s1033_s8 + $0xa0] ss:$8 sps:$4 sm:$0xff]   ;;  %v745_v47 = vmov 1966171168   ;;  %v168_v51 = vshrl.u32 %v167_v49, 7  ;;  %vm149_vm4 = vcmask 785408  }
   0xb   :  { %344 = vmatpush1.bf16.msra.mxu1 %v703_v8  ;;  %v598_v30 = vld [vmem:[%s1034_s4] ss:$0 sm:$0xff]  ;;  %v412_v45 = vld [vmem:[%s1037_s10 + $0x8] sm:$0xff]  ;;  %v165_v48 = vunpack.c.l.s4 %v745_v47  ;;  %v746_v1 = vmov 0   ;;  %vm418_vm5 = vcmask 1043456   ;;  %vm572_vm6 = vcmask 523268  }
   0xc   :  { %345 = vmatprep.subr.bf16.mxu1 %v708_v10  ;;  %v601_v32 = vld [vmem:[%s1035_s5] ss:$0 sm:$0xff]  ;;  %v183_v56 = vsub.s32 0, %v168_v51  ;;  %vm573_vm7 = vmor %vm572_vm6, %vm418_vm5  ;;  %v413_v10 = vld [vmem:[%s1037_s10 + $0x10] sm:$0xf]  ;;  %vm414_vm8 = vcmask 162816  }
   0xd   :  { %v602_v37 = vld [vmem:[%s1036_s6] ss:$0 sm:$0xff]  ;;  %s742_s6 = smov 96   ;;  %v166_v50 = vunpack.c.0.s8 %v165_v48  ;;  %v406_v47 = vld [vmem:[%s1040_s9 + $0x98] sm:$0xff]  ;;  %s747_s17 = smov 52   ;;  %vm583_vm9 = vcmask 424960  }
   0xe   :  { %v411_v44 = vld [vmem:[%s1037_s10] sm:$0xff]  ;;  %vm585_vm10 = vcmask 457728  }
   0xf   :  { %346 = vmatpush1.bf16.msra.mxu1 %v706_v11  ;;  %v655_v46 = vpack.c.bf16 %v412_v45, %v411_v44  ;;  %v603_v52 = vld.sshfl [vmem:[%s1038_s7] sm:$0x11 pattern:$0x75316420]  ;;  %v169_v54 = vsub.s32 %v166_v50, %v168_v51  ;;  %v404_v44 = vld [vmem:[%s1040_s9 + $0x88] sm:$0xff] }
  0x10   :  { %347 = vmatprep.subr.bf16.mxu1 %v711_v12  ;;  %v163_v53 = vcombine.high %v603_v52, %v603_v52  ;;  %v387_v11 = vld [vmem:[%s1040_s9] sm:$0xff]  ;;  %v388_v12 = vld [vmem:[%s1040_s9 + $0x8] sm:$0xff] }
  0x11   :  { %656 = vmatpush3.bf16.msra.mxu0 %v655_v46  ;;  %v170_v58 = vrot.slane %v603_v52, %v169_v54  ;;  %v405_v46 = vld [vmem:[%s1040_s9 + $0x90] sm:$0xff]  ;;  %v407_v49 = vld [vmem:[%s1040_s9 + $0xa0] sm:$0xff]  ;;  %v408_v50 = vld [vmem:[%s1040_s9 + $0xa8] sm:$0xff] }
  0x12   :  { %649 = vmatprep.subr.mxu0 %v739_v0  ;;  %v177_v55 = vrot.slane %v163_v53, %v169_v54  ;;  %v685_v48 = vpack.c.bf16 %v406_v47, %v405_v46  ;;  %v688_v51 = vpack.c.bf16 %v408_v50, %v407_v49  ;;  %v409_v52 = vld [vmem:[%s1040_s9 + $0xb0] sm:$0xff]  ;;  %v410_v53 = vld [vmem:[%s1040_s9 + $0xb8] sm:$0xff] }
  0x13   :  { %348 = vmatpush1.bf16.msra.mxu1 %v709_v13  ;;  %v179_v60 = vpack.i.b16 %v170_v58, %v170_v58  ;;  %v691_v54 = vpack.c.bf16 %v410_v53, %v409_v52 }
  0x14   :  { %349 = vmatprep.subr.bf16.mxu1 %v714_v14  ;;  %v186_v57 = vpack.i.b16 %v177_v55, %v177_v55 }
  0x15   :  { %v184_v0 = vrot.slane %v179_v60, %v183_v56  ;;  %650 = vmatpush3.msk.msra.mxu0 %vm418_vm5, %v413_v10 }
  0x16   :  { %v191_v59 = vrot.slane %v186_v57, %v183_v56  ;;  %657 = vmatprep.subr.bf16.mxu0 %v741_v43 }
  0x17   :  { %350 = vmatpush1.bf16.msra.mxu1 %v712_v15  ;;  %v658_v15 = vpack.c.bf16 %v388_v12, %v387_v11 }
  0x18   :  { %351 = vmatprep.subr.bf16.mxu1 %v717_v16 }
  0x1b   :  { %352 = vmatpush1.bf16.msra.mxu1 %v715_v17 }
  0x1c   :  { %353 = vmatprep.subr.bf16.mxu1 %v720_v18  ;;  %v389_v18 = vld [vmem:[%s1040_s9 + $0x10] sm:$0xff] }
  0x1f   :  { %354 = vmatpush1.bf16.msra.mxu1 %v718_v19  ;;  %v390_v19 = vld [vmem:[%s1040_s9 + $0x18] sm:$0xff] }
  0x20   :  { %355 = vmatprep.subr.bf16.mxu1 %v723_v20 }
  0x23   :  { %356 = vmatpush1.bf16.msra.mxu1 %v721_v21 }
  0x24   :  { %357 = vmatprep.subr.bf16.mxu1 %v726_v22  ;;  %v661_v22 = vpack.c.bf16 %v390_v19, %v389_v18 }
  0x27   :  { %358 = vmatpush1.bf16.msra.mxu1 %v724_v23  ;;  %v391_v23 = vld [vmem:[%s1040_s9 + $0x20] sm:$0xff] }
  0x28   :  { %359 = vmatprep.subr.bf16.mxu1 %v729_v24  ;;  %v392_v24 = vld [vmem:[%s1040_s9 + $0x28] sm:$0xff] }
  0x2b   :  { %360 = vmatpush1.bf16.msra.mxu1 %v727_v25  ;;  %v664_v25 = vpack.c.bf16 %v392_v24, %v391_v23 }
  0x2c   :  { %361 = vmatprep.subr.bf16.mxu1 %v732_v26  ;;  %v393_v26 = vld [vmem:[%s1040_s9 + $0x30] sm:$0xff] }
  0x2f   :  { %362 = vmatpush1.bf16.msra.mxu1 %v730_v27  ;;  %v394_v27 = vld [vmem:[%s1040_s9 + $0x38] sm:$0xff] }
  0x30   :  { %363 = vmatprep.subr.bf16.mxu1 %v735_v28  ;;  %v667_v28 = vpack.c.bf16 %v394_v27, %v393_v26 }
  0x33   :  { %364 = vmatpush1.bf16.msra.mxu1 %v733_v29  ;;  %v395_v29 = vld [vmem:[%s1040_s9 + $0x40] sm:$0xff] }
  0x34   :  { %365 = vmatprep.subr.bf16.mxu1 %v738_v33  ;;  %v398_v33 = vld [vmem:[%s1040_s9 + $0x58] sm:$0xff] }
  0x37   :  { %366 = vmatpush1.bf16.msra.mxu1 %v736_v36  ;;  %v399_v36 = vld [vmem:[%s1040_s9 + $0x60] sm:$0xff] }
  0xdd   :  { %v112_v31 = vpop.f32.mrb[0].mxu1 }
  0xde   :  { %v903_v34 = vadd.f32 %v598_v30, %v112_v31  ;;  %v643_v35 = vpop.f32.mrb[1].mxu1  ;;  %v396_v30 = vld [vmem:[%s1040_s9 + $0x48] sm:$0xff] }
  0xdf   :  { %v115_v38 = vpop.f32.mrb[2].mxu1  ;;  %v670_v31 = vpack.c.bf16 %v396_v30, %v395_v29 }
  0xe0   :  { %v125_v39 = vmul.f32 %v601_v32, %v903_v34  ;;  %v644_v40 = vpop.f32.mrb[3].mxu1  ;;  %v397_v32 = vld [vmem:[%s1040_s9 + $0x50] sm:$0xff] }
  0xe1   :  { %v673_v35 = vpack.c.bf16 %v398_v33, %v397_v32  ;;  %v402_v40 = vld [vmem:[%s1040_s9 + $0x78] sm:$0xff] }
  0xe2   :  { %v133_v41 = vadd.f32 %v602_v37, %v125_v39  ;;  %v400_v37 = vld [vmem:[%s1040_s9 + $0x68] sm:$0xff]  ;;  %v401_v39 = vld [vmem:[%s1040_s9 + $0x70] sm:$0xff] }
  0xe3   :  { %v676_v38 = vpack.c.bf16 %v400_v37, %v399_v36 }
  0xe4   :  { %v134_v42 = vpack.c.bf16 %v133_v41, %v133_v41  ;;  %v679_v41 = vpack.c.bf16 %v402_v40, %v401_v39 }
  0xe6   :  { %140 = vrot.lane.b32.xlu1 %v134_v42, %s742_s6  ;;  %136 = vrot.lane.b32.xlu0 %v134_v42, %s743_s18 }
  0xea   :  { %138 = vrot.lane.b32.xlu0 %v134_v42, %s744_s19 }
 0x158   :  { %v137_v61 = vpop.permute.xlu0 %136  ;;  %v141_v4 = vpop.permute.xlu1 %140 }
 0x159   :  { %v145_v62 = vsel %vm142_vm2, %v134_v42, %v137_v61  ;;  %v403_v42 = vld [vmem:[%s1040_s9 + $0x80] sm:$0xff] }
 0x15a   :  { %v193_v63 = vsub.bf16 %v145_v62, %v191_v59  ;;  %v682_v45 = vpack.c.bf16 %v404_v44, %v403_v42 }
 0x15c   :  { %v195_v2 = vmax.bf16 %v746_v1, %v193_v63  ;;  %v139_v3 = vpop.permute.xlu0 %138 }
 0x15d   :  { %v148_v5 = vsel %vm146_vm3, %v145_v62, %v139_v3 }
 0x15e   :  { %v151_v6 = vsel %vm149_vm4, %v148_v5, %v141_v4  ;;  %628 = vmatprep.mubr.msk.bf16.mxu1 %vm146_vm3, %v195_v2  ;;  %v386_v21 = vunpack.c.l.bf16 %v195_v2 }
 0x15f   :  { %v192_v7 = vsub.bf16 %v151_v6, %v184_v0 }
 0x161   :  { %v927_v8 = vmax.bf16 %v746_v1, %v192_v7 }
 0x163   :  { %376 = vmatmul.mubr.bf16.vlgmr.msra.gmra.mrb[4].mxu1 %v927_v8  ;;  %v632_v9 = vcombine.low %v927_v8, %v195_v2  ;;  %v385_v55 = vunpack.c.l.bf16 %v927_v8 }
 0x165   :  { %574 = vst.msk [vmem:[%s1039_s11] sm:$0xff] %vm573_vm7, %v632_v9 }
 0x236   :  { %v377_v13 = vpop.f32.mrb[4].mxu1 }
 0x237   :  { %v379_v14 = vpop.f32.mrb[5].mxu1 }
 0x238   :  { %v384_v16 = vmin.f32 %v377_v13, %v379_v14  ;;  %v381_v17 = vpop.f32.mrb[6].mxu1 }
 0x239   :  { %v382_v20 = vpop.f32.mrb[7].mxu1 }
 0x23a   :  { %575 = vrot.lane.b32.xlu1 %v384_v16, %s743_s18  ;;  %652 = vmatmul.mubr.msk.f32.vlgmr.msra.gmra.mrb[0].mxu0 %vm414_vm8, %v384_v16 }
 0x23b   :  { %659 = vmatpush1.bf16.msra.mxu0 %v658_v15  ;;  %631 = vmatprep.mubr.msk.f32.mxu0 %vm146_vm3, %v386_v21 }
 0x23c   :  { %660 = vmatprep.subr.bf16.mxu0 %v741_v43 }
 0x23f   :  { %662 = vmatpush1.bf16.msra.mxu0 %v661_v22 }
 0x240   :  { %663 = vmatprep.subr.bf16.mxu0 %v741_v43 }
 0x243   :  { %665 = vmatpush1.bf16.msra.mxu0 %v664_v25 }
 0x244   :  { %666 = vmatprep.subr.bf16.mxu0 %v741_v43 }
 0x247   :  { %668 = vmatpush1.bf16.msra.mxu0 %v667_v28 }
 0x248   :  { %669 = vmatprep.subr.bf16.mxu0 %v741_v43 }
 0x24b   :  { %671 = vmatpush1.bf16.msra.mxu0 %v670_v31 }
 0x24c   :  { %672 = vmatprep.subr.bf16.mxu0 %v741_v43 }
 0x24f   :  { %674 = vmatpush1.bf16.msra.mxu0 %v673_v35 }
 0x250   :  { %675 = vmatprep.subr.bf16.mxu0 %v741_v43 }
 0x253   :  { %677 = vmatpush1.bf16.msra.mxu0 %v676_v38 }
 0x254   :  { %678 = vmatprep.subr.bf16.mxu0 %v741_v43 }
 0x257   :  { %680 = vmatpush1.bf16.msra.mxu0 %v679_v41 }
 0x258   :  { %681 = vmatprep.subr.bf16.mxu0 %v741_v43 }
 0x25b   :  { %683 = vmatpush1.bf16.msra.mxu0 %v682_v45 }
 0x25c   :  { %684 = vmatprep.subr.bf16.mxu0 %v741_v43 }
 0x25f   :  { %686 = vmatpush1.bf16.msra.mxu0 %v685_v48 }
 0x260   :  { %687 = vmatprep.subr.bf16.mxu0 %v741_v43 }
 0x263   :  { %689 = vmatpush1.bf16.msra.mxu0 %v688_v51 }
 0x264   :  { %690 = vmatprep.subr.bf16.mxu0 %v741_v43 }
 0x267   :  { %692 = vmatpush1.bf16.msra.mxu0 %v691_v54 }
 0x26a   :  { %560 = vmatmul.mubr.f32.vlgmr.msra.gmra.mrb[2].mxu0 %v385_v55 }
 0x2ac   :  { %v576_v62 = vpop.permute.xlu1 %575 }
 0x2ad   :  { %v582_v63 = vsel %vm142_vm2, %v903_v34, %v576_v62 }
 0x30d   :  { %v488_v56 = vpop.f32.mrb[0].mxu0 }
 0x30e   :  { %v653_v57 = vpop.f32.mrb[1].mxu0 }
 0x33d   :  { %v561_v58 = vpop.f32.mrb[2].mxu0 }
 0x33e   :  { %v562_v59 = vadd.f32 %v561_v58, %v488_v56  ;;  %v563_v60 = vpop.f32.mrb[3].mxu0 }
 0x340   :  { %v565_v61 = vadd.f32 -1.0208853, %v562_v59 }
 0x342   :  { %579 = vrot.lane.b32.xlu0 %v565_v61, %s747_s17 }
 0x3b4   :  { %v580_v0 = vpop.permute.xlu0 %579 }
 0x3b5   :  { %v584_v43 = vsel %vm583_vm9, %v582_v63, %v580_v0 }
 0x3b6   :  { %v586_v1 = vsel %vm585_vm10, %v584_v43, 0.0 }
 0x3b7   :  { %587 = vst [vmem:[%s1041_s12] sm:$0xff] %v586_v1 }

</bundles_post_ra>
